<compile_context>
chip_gen: v7x
topology: tpu7x:2x2x1
jax: 0.10.0
libtpu: 0.0.40
codegen_flags: <defaults>
</compile_context>

<pallas_src>
import functools

import jax
import jax.numpy as jnp
import numpy as np
from jax import lax
from jax.experimental import pallas as pl
from jax.experimental.pallas import tpu as pltpu


LSTM_INPUT_DIM = 43   # fixed in the PyTorch module
LANE = 128            # TPU lane width
N_HEADS_TOTAL = 2 + 7 + 24 + 10   # 43


def _round_up(x, m):
    return (x + m - 1) // m * m


# ----------------------------------------------------------------------------
# Fused generator kernel: dense -> LSTM recurrence -> heads, all in VMEM/vregs.
# Gate order follows PyTorch: i, f, g, o.
# ----------------------------------------------------------------------------
def _generator_kernel(x_ref, dw_ref, db_ref, wih_ref, bg_ref, whh_ref,
                      bh_ref, wh_hbm_ref, out_ref, wh_vmem, wh_sem,
                      *, seq_len, chunk_batch, hidden):
    T, Bc, H = seq_len, chunk_batch, hidden

    # Head weights are only needed AFTER the recurrence: start their DMA now so
    # the transfer is fully hidden behind the serial time loop.
    wh_copy = pltpu.make_async_copy(wh_hbm_ref, wh_vmem, wh_sem)
    wh_copy.start()

    # ---- time-parallel prologue (off the serial critical path) -------------
    # dense: Linear(input_dim -> 43) for all (t, b) rows at once.
    x43 = (jnp.dot(x_ref[...], dw_ref[...], preferred_element_type=jnp.float32)
           + db_ref[...])                                            # (T*Bc, 43)
    # Input projection of all four gates for all timesteps in one matmul.
    # Kept as a traced value (a couple of vregs) — no VMEM scratch round-trip.
    gx = (jnp.dot(x43, wih_ref[...], preferred_element_type=jnp.float32)
          + bg_ref[...])                                             # (T*Bc, 4H)

    def sigmoid(v):
        # one EUP tanh + VPU fma; cheaper than exp + divide on the serial path
        return 0.5 * jnp.tanh(0.5 * v) + 0.5

    # ---- serial recurrence: fully unrolled (T is a trace-time constant) ----
    h = jnp.zeros((Bc, H), jnp.float32)
    c = jnp.zeros((Bc, H), jnp.float32)
    hs = []
    for t in range(T):
        gates = (gx[t * Bc:(t + 1) * Bc, :]
                 + jnp.dot(h, whh_ref[...],
                           preferred_element_type=jnp.float32))      # (Bc, 4H)
        i_g = sigmoid(gates[:, 0 * H:1 * H])
        f_g = sigmoid(gates[:, 1 * H:2 * H])
        g_g = jnp.tanh(gates[:, 2 * H:3 * H])
        o_g = sigmoid(gates[:, 3 * H:4 * H])
        c = f_g * c + i_g * g_g
        h = o_g * jnp.tanh(c)
        hs.append(h)                       # stays in vregs (no masked vst)

    hs_all = jnp.concatenate(hs, axis=0)   # (T*Bc, H), one-time epilogue gather

    # ---- fused output heads: one lane-dense (T*Bc, 128) store ---------------
    wh_copy.wait()
    out_ref[...] = (jnp.dot(hs_all, wh_vmem[...],
                            preferred_element_type=jnp.float32)
                    + bh_ref[...])


# ----------------------------------------------------------------------------
# One-time parameter preparation (hoisted out of the forward path):
# transposes, bias fusion, head concatenation.  Weights stay COMPACT — only
# the output slab (head weights/bias columns) is padded to a 128-lane tile.
# ----------------------------------------------------------------------------
def prepare_params(params):
    f32 = jnp.float32
    H = params["w_hh"].shape[1]
    n_out = _round_up(N_HEADS_TOTAL, LANE)

    dense_w_t = jnp.transpose(params["dense_w"]).astype(f32)            # (D, 43)
    dense_b = params["dense_b"].reshape(1, LSTM_INPUT_DIM).astype(f32)  # (1, 43)

    w_ih_t = jnp.transpose(params["w_ih"]).astype(f32)                  # (43, 4H)
    whh_t = jnp.transpose(params["w_hh"]).astype(f32)                   # (H, 4H)
    b_gates = (params["b_ih"] + params["b_hh"]).reshape(1, 4 * H).astype(f32)

    w_heads = jnp.concatenate(
        [jnp.transpose(params["fc_latlon_w"]),
         jnp.transpose(params["fc_day_w"]),
         jnp.transpose(params["fc_hour_w"]),
         jnp.transpose(params["fc_category_w"])], axis=1).astype(f32)   # (H, 43)
    b_heads = jnp.concatenate(
        [params["fc_latlon_b"], params["fc_day_b"],
         params["fc_hour_b"], params["fc_category_b"]]).astype(f32)     # (43,)

    w_heads_p = jnp.zeros((H, n_out), f32).at[:, :N_HEADS_TOTAL].set(w_heads)
    b_heads_p = jnp.zeros((1, n_out), f32).at[0, :N_HEADS_TOTAL].set(b_heads)

    return {
        "dense_w_t": dense_w_t, "dense_b": dense_b,
        "w_ih_t": w_ih_t, "b_gates": b_gates, "whh_t": whh_t,
        "w_heads": w_heads_p, "b_heads": b_heads_p,
    }


def _default_batch_chunks(batch):
    """Use both TensorCores on multi-TC chips (v7x) by splitting the batch."""
    if batch < 2 or batch % 2 != 0:
        return 1
    try:
        kind = jax.devices()[0].device_kind.lower()
    except Exception:
        return 1
    return 2 if ("v7" in kind or "7x" in kind) else 1


# ----------------------------------------------------------------------------
# Full generator forward (single fused pallas_call)
# ----------------------------------------------------------------------------
def generator_forward(prepped, x, *, num_batch_chunks=1):
    """x: (T, B, input_dim) f32 -> (lat_lon, day, hour, category)."""
    T, B, D = x.shape
    H = prepped["whh_t"].shape[0]           # hidden dim (static python int)
    n_out = prepped["w_heads"].shape[1]     # padded head width (128)

    G = num_batch_chunks
    if G < 1 or B % G != 0 or (T * (B // G)) % 8 != 0:
        G = 1                                # fall back to a single grid step
    Bc = B // G
    TBc = T * Bc

    # Rows: chunk-major, then time-major within a chunk (row = g*T*Bc + t*Bc + b).
    x_flat = (x.astype(jnp.float32)
              .reshape(T, G, Bc, D).transpose(1, 0, 2, 3).reshape(G * TBc, D))

    kernel = functools.partial(_generator_kernel,
                               seq_len=T, chunk_batch=Bc, hidden=H)

    out = pl.pallas_call(
        kernel,
        out_shape=jax.ShapeDtypeStruct((G * TBc, n_out), jnp.float32),
        grid=(G,),
        in_specs=[
            pl.BlockSpec((TBc, D), lambda g: (g, 0)),                    # x (batch chunk)
            pl.BlockSpec((D, LSTM_INPUT_DIM), lambda g: (0, 0)),         # dense W^T
            pl.BlockSpec((1, LSTM_INPUT_DIM), lambda g: (0, 0)),         # dense b
            pl.BlockSpec((LSTM_INPUT_DIM, 4 * H), lambda g: (0, 0)),     # W_ih^T (compact)
            pl.BlockSpec((1, 4 * H), lambda g: (0, 0)),                  # b_ih + b_hh
            pl.BlockSpec((H, 4 * H), lambda g: (0, 0)),                  # W_hh^T (compact)
            pl.BlockSpec((1, n_out), lambda g: (0, 0)),                  # head bias
            pl.BlockSpec(memory_space=pl.ANY),                           # head weights (HBM)
        ],
        out_specs=pl.BlockSpec((TBc, n_out), lambda g: (g, 0)),
        scratch_shapes=[
            pltpu.VMEM((H, n_out), jnp.float32),    # head-weight landing buffer
            pltpu.SemaphoreType.DMA(()),            # its DMA semaphore
        ],
        compiler_params=pltpu.CompilerParams(
            dimension_semantics=("parallel",),      # batch chunks are independent
        ),
    )(x_flat, prepped["dense_w_t"], prepped["dense_b"], prepped["w_ih_t"],
      prepped["b_gates"], prepped["whh_t"], prepped["b_heads"],
      prepped["w_heads"])

    out = (out.reshape(G, T, Bc, n_out).transpose(1, 0, 2, 3)
           .reshape(T, B, n_out))
    lat_lon = out[..., 0:2]
    day = out[..., 2:9]
    hour = out[..., 9:33]
    category = out[..., 33:43]
    return lat_lon, day, hour, category


# ----------------------------------------------------------------------------
# Parameter init (same shapes as the PyTorch module)
# ----------------------------------------------------------------------------
def init_params(key, input_dim, hidden_dim):
    ks = jax.random.split(key, 12)
    u = lambda k, shape, s: jax.random.uniform(k, shape, jnp.float32, -s, s)
    sd = 1.0 / np.sqrt(input_dim)
    sh = 1.0 / np.sqrt(hidden_dim)
    H = hidden_dim
    return {
        "dense_w": u(ks[0], (LSTM_INPUT_DIM, input_dim), sd),
        "dense_b": u(ks[1], (LSTM_INPUT_DIM,), sd),
        "w_ih": u(ks[2], (4 * H, LSTM_INPUT_DIM), sh),
        "w_hh": u(ks[3], (4 * H, H), sh),
        "b_ih": u(ks[4], (4 * H,), sh),
        "b_hh": u(ks[5], (4 * H,), sh),
        "fc_latlon_w": u(ks[6], (2, H), sh),
        "fc_latlon_b": u(ks[7], (2,), sh),
        "fc_day_w": u(ks[8], (7, H), sh),
        "fc_day_b": u(ks[9], (7,), sh),
        "fc_hour_w": u(ks[10], (24, H), sh),
        "fc_hour_b": u(ks[11], (24,), sh),
        "fc_category_w": u(jax.random.fold_in(key, 100), (10, H), sh),
        "fc_category_b": u(jax.random.fold_in(key, 101), (10,), sh),
    }


# ----------------------------------------------------------------------------
# Pure-JAX reference (mirrors the PyTorch forward)
# ----------------------------------------------------------------------------
def generator_reference(params, x, hidden_dim):
    T, B, D = x.shape
    H = hidden_dim
    x43 = jnp.einsum("tbd,od->tbo", x, params["dense_w"]) + params["dense_b"]

    w_ih, w_hh = params["w_ih"], params["w_hh"]
    b = params["b_ih"] + params["b_hh"]

    def step(carry, x_t):
        h, c = carry
        gates = x_t @ w_ih.T + h @ w_hh.T + b
        i_g = jax.nn.sigmoid(gates[:, 0 * H:1 * H])
        f_g = jax.nn.sigmoid(gates[:, 1 * H:2 * H])
        g_g = jnp.tanh(gates[:, 2 * H:3 * H])
        o_g = jax.nn.sigmoid(gates[:, 3 * H:4 * H])
        c = f_g * c + i_g * g_g
        h = o_g * jnp.tanh(c)
        return (h, c), h

    h0 = jnp.zeros((B, H), jnp.float32)
    c0 = jnp.zeros((B, H), jnp.float32)
    _, hs = lax.scan(step, (h0, c0), x43)

    lin = lambda w, bb: jnp.einsum("tbh,oh->tbo", hs, w) + bb
    return (
        lin(params["fc_latlon_w"], params["fc_latlon_b"]),
        lin(params["fc_day_w"], params["fc_day_b"]),
        lin(params["fc_hour_w"], params["fc_hour_b"]),
        lin(params["fc_category_w"], params["fc_category_b"]),
    )


if __name__ == "__main__":
    SEQ, BATCH, INPUT_DIM, HIDDEN = 8, 2, 16, 32

    key = jax.random.PRNGKey(0)
    k_params, k_x = jax.random.split(key)
    params = init_params(k_params, INPUT_DIM, HIDDEN)
    x = jax.random.normal(k_x, (SEQ, BATCH, INPUT_DIM), jnp.float32)

    # One-time parameter preparation (transposes / fusion hoisted out of the
    # forward path).
    prepped = jax.tree_util.tree_map(jax.block_until_ready,
                                     prepare_params(params))

    # v7x: 2 batch chunks -> one per TensorCore; v5e/v6e: 1 (single TC).
    G = _default_batch_chunks(BATCH)
    fwd = jax.jit(functools.partial(generator_forward, num_batch_chunks=G))
    outs = jax.block_until_ready(fwd(prepped, x))

    refs = jax.block_until_ready(generator_reference(params, x, HIDDEN))

    for o, r in zip(outs, refs):
        assert o.shape == r.shape, (o.shape, r.shape)
        np.testing.assert_allclose(np.asarray(o), np.asarray(r),
                                   atol=1e-4, rtol=1e-4)

    print("KERNEL_OK")
</pallas_src>

<mosaic_0001>
module attributes {stable_mosaic.version = 11 : i64} {
  func.func @_generator_kernel(%arg0: i32, %arg1: memref<16x16xf32, #tpu.memory_space<vmem>>, %arg2: memref<16x43xf32, #tpu.memory_space<vmem>>, %arg3: memref<1x43xf32, #tpu.memory_space<vmem>>, %arg4: memref<43x128xf32, #tpu.memory_space<vmem>>, %arg5: memref<1x128xf32, #tpu.memory_space<vmem>>, %arg6: memref<32x128xf32, #tpu.memory_space<vmem>>, %arg7: memref<1x128xf32, #tpu.memory_space<vmem>>, %arg8: memref<32x128xf32, #tpu.memory_space<any>>, %arg9: memref<16x128xf32, #tpu.memory_space<vmem>>, %arg10: memref<32x128xf32, #tpu.memory_space<vmem>>, %arg11: memref<!tpu.dma_semaphore, #tpu.memory_space<semaphore_mem>>) attributes {dimension_semantics = [#tpu.dimension_semantics<parallel>], iteration_bounds = array<i64: 1>, scalar_prefetch = 0 : i64, scratch_operands = 2 : i64, tpu.core_type = #tpu.core_type<tc>, window_params = [{transform_indices = @transform_0, window_bounds = array<i64: 16, 16>}, {pipeline_mode = #tpu.pipeline_mode<synchronous>, transform_indices = @transform_1, window_bounds = array<i64: 16, 43>}, {pipeline_mode = #tpu.pipeline_mode<synchronous>, transform_indices = @transform_2, window_bounds = array<i64: 1, 43>}, {pipeline_mode = #tpu.pipeline_mode<synchronous>, transform_indices = @transform_3, window_bounds = array<i64: 43, 128>}, {pipeline_mode = #tpu.pipeline_mode<synchronous>, transform_indices = @transform_4, window_bounds = array<i64: 1, 128>}, {pipeline_mode = #tpu.pipeline_mode<synchronous>, transform_indices = @transform_5, window_bounds = array<i64: 32, 128>}, {pipeline_mode = #tpu.pipeline_mode<synchronous>, transform_indices = @transform_6, window_bounds = array<i64: 1, 128>}, {}, {transform_indices = @transform_8, window_bounds = array<i64: 16, 128>}]} {
    tpu.enqueue_dma source(%arg8 : memref<32x128xf32, #tpu.memory_space<any>>) target(%arg10 : memref<32x128xf32, #tpu.memory_space<vmem>>) target_semaphore(%arg11 : memref<!tpu.dma_semaphore, #tpu.memory_space<semaphore_mem>>)
    %c0 = arith.constant 0 : index
    %c0_0 = arith.constant 0 : index
    %0 = vector.load %arg1[%c0, %c0_0] : memref<16x16xf32, #tpu.memory_space<vmem>>, vector<16x16xf32>
    %c0_1 = arith.constant 0 : index
    %c0_2 = arith.constant 0 : index
    %1 = vector.load %arg2[%c0_1, %c0_2] : memref<16x43xf32, #tpu.memory_space<vmem>>, vector<16x43xf32>
    %cst = arith.constant dense<0.000000e+00> : vector<16x43xf32>
    %2 = tpu.matmul %0, %1, %cst {dimension_numbers = #tpu.dot_dimension_numbers<[1], [0], [0], [1], [0, 0, 1, 1], [], []>} : vector<16x16xf32>, vector<16x43xf32>, vector<16x43xf32> -> vector<16x43xf32>
    %c0_3 = arith.constant 0 : index
    %c0_4 = arith.constant 0 : index
    %3 = vector.load %arg3[%c0_3, %c0_4] : memref<1x43xf32, #tpu.memory_space<vmem>>, vector<1x43xf32>
    %4 = vector.broadcast %3 : vector<1x43xf32> to vector<16x43xf32>
    %5 = arith.addf %2, %4 : vector<16x43xf32>
    %c0_5 = arith.constant 0 : index
    %c0_6 = arith.constant 0 : index
    %6 = vector.load %arg4[%c0_5, %c0_6] : memref<43x128xf32, #tpu.memory_space<vmem>>, vector<43x128xf32>
    %cst_7 = arith.constant dense<0.000000e+00> : vector<16x128xf32>
    %7 = tpu.matmul %5, %6, %cst_7 {dimension_numbers = #tpu.dot_dimension_numbers<[1], [0], [0], [1], [0, 0, 1, 1], [], []>} : vector<16x43xf32>, vector<43x128xf32>, vector<16x128xf32> -> vector<16x128xf32>
    %c0_8 = arith.constant 0 : index
    %c0_9 = arith.constant 0 : index
    %8 = vector.load %arg5[%c0_8, %c0_9] : memref<1x128xf32, #tpu.memory_space<vmem>>, vector<1x128xf32>
    %9 = vector.broadcast %8 : vector<1x128xf32> to vector<16x128xf32>
    %10 = arith.addf %7, %9 : vector<16x128xf32>
    %cst_10 = arith.constant 0.000000e+00 : f32
    %11 = vector.broadcast %cst_10 : f32 to vector<2x32xf32>
    %cst_11 = arith.constant 0.000000e+00 : f32
    %12 = vector.broadcast %cst_11 : f32 to vector<2x32xf32>
    %13 = vector.extract_strided_slice %10 {offsets = [0, 0], sizes = [2, 128], strides = [1, 1]} : vector<16x128xf32> to vector<2x128xf32>
    %c0_12 = arith.constant 0 : index
    %c0_13 = arith.constant 0 : index
    %14 = vector.load %arg6[%c0_12, %c0_13] : memref<32x128xf32, #tpu.memory_space<vmem>>, vector<32x128xf32>
    %cst_14 = arith.constant dense<0.000000e+00> : vector<2x128xf32>
    %15 = tpu.matmul %11, %14, %cst_14 {dimension_numbers = #tpu.dot_dimension_numbers<[1], [0], [0], [1], [0, 0, 1, 1], [], []>} : vector<2x32xf32>, vector<32x128xf32>, vector<2x128xf32> -> vector<2x128xf32>
    %16 = arith.addf %13, %15 : vector<2x128xf32>
    %17 = vector.extract_strided_slice %16 {offsets = [0, 0], sizes = [2, 32], strides = [1, 1]} : vector<2x128xf32> to vector<2x32xf32>
    %cst_15 = arith.constant 5.000000e-01 : f32
    %18 = vector.broadcast %cst_15 : f32 to vector<2x32xf32>
    %19 = arith.mulf %18, %17 : vector<2x32xf32>
    %20 = math.tanh %19 : vector<2x32xf32>
    %cst_16 = arith.constant 5.000000e-01 : f32
    %21 = vector.broadcast %cst_16 : f32 to vector<2x32xf32>
    %22 = arith.mulf %21, %20 : vector<2x32xf32>
    %cst_17 = arith.constant 5.000000e-01 : f32
    %23 = vector.broadcast %cst_17 : f32 to vector<2x32xf32>
    %24 = arith.addf %22, %23 : vector<2x32xf32>
    %25 = vector.extract_strided_slice %16 {offsets = [0, 32], sizes = [2, 32], strides = [1, 1]} : vector<2x128xf32> to vector<2x32xf32>
    %cst_18 = arith.constant 5.000000e-01 : f32
    %26 = vector.broadcast %cst_18 : f32 to vector<2x32xf32>
    %27 = arith.mulf %26, %25 : vector<2x32xf32>
    %28 = math.tanh %27 : vector<2x32xf32>
    %cst_19 = arith.constant 5.000000e-01 : f32
    %29 = vector.broadcast %cst_19 : f32 to vector<2x32xf32>
    %30 = arith.mulf %29, %28 : vector<2x32xf32>
    %cst_20 = arith.constant 5.000000e-01 : f32
    %31 = vector.broadcast %cst_20 : f32 to vector<2x32xf32>
    %32 = arith.addf %30, %31 : vector<2x32xf32>
    %33 = vector.extract_strided_slice %16 {offsets = [0, 64], sizes = [2, 32], strides = [1, 1]} : vector<2x128xf32> to vector<2x32xf32>
    %34 = math.tanh %33 : vector<2x32xf32>
    %35 = vector.extract_strided_slice %16 {offsets = [0, 96], sizes = [2, 32], strides = [1, 1]} : vector<2x128xf32> to vector<2x32xf32>
    %cst_21 = arith.constant 5.000000e-01 : f32
    %36 = vector.broadcast %cst_21 : f32 to vector<2x32xf32>
    %37 = arith.mulf %36, %35 : vector<2x32xf32>
    %38 = math.tanh %37 : vector<2x32xf32>
    %cst_22 = arith.constant 5.000000e-01 : f32
    %39 = vector.broadcast %cst_22 : f32 to vector<2x32xf32>
    %40 = arith.mulf %39, %38 : vector<2x32xf32>
    %cst_23 = arith.constant 5.000000e-01 : f32
    %41 = vector.broadcast %cst_23 : f32 to vector<2x32xf32>
    %42 = arith.addf %40, %41 : vector<2x32xf32>
    %43 = arith.mulf %32, %12 : vector<2x32xf32>
    %44 = arith.mulf %24, %34 : vector<2x32xf32>
    %45 = arith.addf %43, %44 : vector<2x32xf32>
    %46 = math.tanh %45 : vector<2x32xf32>
    %47 = arith.mulf %42, %46 : vector<2x32xf32>
    %48 = vector.extract_strided_slice %10 {offsets = [2, 0], sizes = [2, 128], strides = [1, 1]} : vector<16x128xf32> to vector<2x128xf32>
    %c0_24 = arith.constant 0 : index
    %c0_25 = arith.constant 0 : index
    %49 = vector.load %arg6[%c0_24, %c0_25] : memref<32x128xf32, #tpu.memory_space<vmem>>, vector<32x128xf32>
    %cst_26 = arith.constant dense<0.000000e+00> : vector<2x128xf32>
    %50 = tpu.matmul %47, %49, %cst_26 {dimension_numbers = #tpu.dot_dimension_numbers<[1], [0], [0], [1], [0, 0, 1, 1], [], []>} : vector<2x32xf32>, vector<32x128xf32>, vector<2x128xf32> -> vector<2x128xf32>
    %51 = arith.addf %48, %50 : vector<2x128xf32>
    %52 = vector.extract_strided_slice %51 {offsets = [0, 0], sizes = [2, 32], strides = [1, 1]} : vector<2x128xf32> to vector<2x32xf32>
    %cst_27 = arith.constant 5.000000e-01 : f32
    %53 = vector.broadcast %cst_27 : f32 to vector<2x32xf32>
    %54 = arith.mulf %53, %52 : vector<2x32xf32>
    %55 = math.tanh %54 : vector<2x32xf32>
    %cst_28 = arith.constant 5.000000e-01 : f32
    %56 = vector.broadcast %cst_28 : f32 to vector<2x32xf32>
    %57 = arith.mulf %56, %55 : vector<2x32xf32>
    %cst_29 = arith.constant 5.000000e-01 : f32
    %58 = vector.broadcast %cst_29 : f32 to vector<2x32xf32>
    %59 = arith.addf %57, %58 : vector<2x32xf32>
    %60 = vector.extract_strided_slice %51 {offsets = [0, 32], sizes = [2, 32], strides = [1, 1]} : vector<2x128xf32> to vector<2x32xf32>
    %cst_30 = arith.constant 5.000000e-01 : f32
    %61 = vector.broadcast %cst_30 : f32 to vector<2x32xf32>
    %62 = arith.mulf %61, %60 : vector<2x32xf32>
    %63 = math.tanh %62 : vector<2x32xf32>
    %cst_31 = arith.constant 5.000000e-01 : f32
    %64 = vector.broadcast %cst_31 : f32 to vector<2x32xf32>
    %65 = arith.mulf %64, %63 : vector<2x32xf32>
    %cst_32 = arith.constant 5.000000e-01 : f32
    %66 = vector.broadcast %cst_32 : f32 to vector<2x32xf32>
    %67 = arith.addf %65, %66 : vector<2x32xf32>
    %68 = vector.extract_strided_slice %51 {offsets = [0, 64], sizes = [2, 32], strides = [1, 1]} : vector<2x128xf32> to vector<2x32xf32>
    %69 = math.tanh %68 : vector<2x32xf32>
    %70 = vector.extract_strided_slice %51 {offsets = [0, 96], sizes = [2, 32], strides = [1, 1]} : vector<2x128xf32> to vector<2x32xf32>
    %cst_33 = arith.constant 5.000000e-01 : f32
    %71 = vector.broadcast %cst_33 : f32 to vector<2x32xf32>
    %72 = arith.mulf %71, %70 : vector<2x32xf32>
    %73 = math.tanh %72 : vector<2x32xf32>
    %cst_34 = arith.constant 5.000000e-01 : f32
    %74 = vector.broadcast %cst_34 : f32 to vector<2x32xf32>
    %75 = arith.mulf %74, %73 : vector<2x32xf32>
    %cst_35 = arith.constant 5.000000e-01 : f32
    %76 = vector.broadcast %cst_35 : f32 to vector<2x32xf32>
    %77 = arith.addf %75, %76 : vector<2x32xf32>
    %78 = arith.mulf %67, %45 : vector<2x32xf32>
    %79 = arith.mulf %59, %69 : vector<2x32xf32>
    %80 = arith.addf %78, %79 : vector<2x32xf32>
    %81 = math.tanh %80 : vector<2x32xf32>
    %82 = arith.mulf %77, %81 : vector<2x32xf32>
    %83 = vector.extract_strided_slice %10 {offsets = [4, 0], sizes = [2, 128], strides = [1, 1]} : vector<16x128xf32> to vector<2x128xf32>
    %c0_36 = arith.constant 0 : index
    %c0_37 = arith.constant 0 : index
    %84 = vector.load %arg6[%c0_36, %c0_37] : memref<32x128xf32, #tpu.memory_space<vmem>>, vector<32x128xf32>
    %cst_38 = arith.constant dense<0.000000e+00> : vector<2x128xf32>
    %85 = tpu.matmul %82, %84, %cst_38 {dimension_numbers = #tpu.dot_dimension_numbers<[1], [0], [0], [1], [0, 0, 1, 1], [], []>} : vector<2x32xf32>, vector<32x128xf32>, vector<2x128xf32> -> vector<2x128xf32>
    %86 = arith.addf %83, %85 : vector<2x128xf32>
    %87 = vector.extract_strided_slice %86 {offsets = [0, 0], sizes = [2, 32], strides = [1, 1]} : vector<2x128xf32> to vector<2x32xf32>
    %cst_39 = arith.constant 5.000000e-01 : f32
    %88 = vector.broadcast %cst_39 : f32 to vector<2x32xf32>
    %89 = arith.mulf %88, %87 : vector<2x32xf32>
    %90 = math.tanh %89 : vector<2x32xf32>
    %cst_40 = arith.constant 5.000000e-01 : f32
    %91 = vector.broadcast %cst_40 : f32 to vector<2x32xf32>
    %92 = arith.mulf %91, %90 : vector<2x32xf32>
    %cst_41 = arith.constant 5.000000e-01 : f32
    %93 = vector.broadcast %cst_41 : f32 to vector<2x32xf32>
    %94 = arith.addf %92, %93 : vector<2x32xf32>
    %95 = vector.extract_strided_slice %86 {offsets = [0, 32], sizes = [2, 32], strides = [1, 1]} : vector<2x128xf32> to vector<2x32xf32>
    %cst_42 = arith.constant 5.000000e-01 : f32
    %96 = vector.broadcast %cst_42 : f32 to vector<2x32xf32>
    %97 = arith.mulf %96, %95 : vector<2x32xf32>
    %98 = math.tanh %97 : vector<2x32xf32>
    %cst_43 = arith.constant 5.000000e-01 : f32
    %99 = vector.broadcast %cst_43 : f32 to vector<2x32xf32>
    %100 = arith.mulf %99, %98 : vector<2x32xf32>
    %cst_44 = arith.constant 5.000000e-01 : f32
    %101 = vector.broadcast %cst_44 : f32 to vector<2x32xf32>
    %102 = arith.addf %100, %101 : vector<2x32xf32>
    %103 = vector.extract_strided_slice %86 {offsets = [0, 64], sizes = [2, 32], strides = [1, 1]} : vector<2x128xf32> to vector<2x32xf32>
    %104 = math.tanh %103 : vector<2x32xf32>
    %105 = vector.extract_strided_slice %86 {offsets = [0, 96], sizes = [2, 32], strides = [1, 1]} : vector<2x128xf32> to vector<2x32xf32>
    %cst_45 = arith.constant 5.000000e-01 : f32
    %106 = vector.broadcast %cst_45 : f32 to vector<2x32xf32>
    %107 = arith.mulf %106, %105 : vector<2x32xf32>
    %108 = math.tanh %107 : vector<2x32xf32>
    %cst_46 = arith.constant 5.000000e-01 : f32
    %109 = vector.broadcast %cst_46 : f32 to vector<2x32xf32>
    %110 = arith.mulf %109, %108 : vector<2x32xf32>
    %cst_47 = arith.constant 5.000000e-01 : f32
    %111 = vector.broadcast %cst_47 : f32 to vector<2x32xf32>
    %112 = arith.addf %110, %111 : vector<2x32xf32>
    %113 = arith.mulf %102, %80 : vector<2x32xf32>
    %114 = arith.mulf %94, %104 : vector<2x32xf32>
    %115 = arith.addf %113, %114 : vector<2x32xf32>
    %116 = math.tanh %115 : vector<2x32xf32>
    %117 = arith.mulf %112, %116 : vector<2x32xf32>
    %118 = vector.extract_strided_slice %10 {offsets = [6, 0], sizes = [2, 128], strides = [1, 1]} : vector<16x128xf32> to vector<2x128xf32>
    %c0_48 = arith.constant 0 : index
    %c0_49 = arith.constant 0 : index
    %119 = vector.load %arg6[%c0_48, %c0_49] : memref<32x128xf32, #tpu.memory_space<vmem>>, vector<32x128xf32>
    %cst_50 = arith.constant dense<0.000000e+00> : vector<2x128xf32>
    %120 = tpu.matmul %117, %119, %cst_50 {dimension_numbers = #tpu.dot_dimension_numbers<[1], [0], [0], [1], [0, 0, 1, 1], [], []>} : vector<2x32xf32>, vector<32x128xf32>, vector<2x128xf32> -> vector<2x128xf32>
    %121 = arith.addf %118, %120 : vector<2x128xf32>
    %122 = vector.extract_strided_slice %121 {offsets = [0, 0], sizes = [2, 32], strides = [1, 1]} : vector<2x128xf32> to vector<2x32xf32>
    %cst_51 = arith.constant 5.000000e-01 : f32
    %123 = vector.broadcast %cst_51 : f32 to vector<2x32xf32>
    %124 = arith.mulf %123, %122 : vector<2x32xf32>
    %125 = math.tanh %124 : vector<2x32xf32>
    %cst_52 = arith.constant 5.000000e-01 : f32
    %126 = vector.broadcast %cst_52 : f32 to vector<2x32xf32>
    %127 = arith.mulf %126, %125 : vector<2x32xf32>
    %cst_53 = arith.constant 5.000000e-01 : f32
    %128 = vector.broadcast %cst_53 : f32 to vector<2x32xf32>
    %129 = arith.addf %127, %128 : vector<2x32xf32>
    %130 = vector.extract_strided_slice %121 {offsets = [0, 32], sizes = [2, 32], strides = [1, 1]} : vector<2x128xf32> to vector<2x32xf32>
    %cst_54 = arith.constant 5.000000e-01 : f32
    %131 = vector.broadcast %cst_54 : f32 to vector<2x32xf32>
    %132 = arith.mulf %131, %130 : vector<2x32xf32>
    %133 = math.tanh %132 : vector<2x32xf32>
    %cst_55 = arith.constant 5.000000e-01 : f32
    %134 = vector.broadcast %cst_55 : f32 to vector<2x32xf32>
    %135 = arith.mulf %134, %133 : vector<2x32xf32>
    %cst_56 = arith.constant 5.000000e-01 : f32
    %136 = vector.broadcast %cst_56 : f32 to vector<2x32xf32>
    %137 = arith.addf %135, %136 : vector<2x32xf32>
    %138 = vector.extract_strided_slice %121 {offsets = [0, 64], sizes = [2, 32], strides = [1, 1]} : vector<2x128xf32> to vector<2x32xf32>
    %139 = math.tanh %138 : vector<2x32xf32>
    %140 = vector.extract_strided_slice %121 {offsets = [0, 96], sizes = [2, 32], strides = [1, 1]} : vector<2x128xf32> to vector<2x32xf32>
    %cst_57 = arith.constant 5.000000e-01 : f32
    %141 = vector.broadcast %cst_57 : f32 to vector<2x32xf32>
    %142 = arith.mulf %141, %140 : vector<2x32xf32>
    %143 = math.tanh %142 : vector<2x32xf32>
    %cst_58 = arith.constant 5.000000e-01 : f32
    %144 = vector.broadcast %cst_58 : f32 to vector<2x32xf32>
    %145 = arith.mulf %144, %143 : vector<2x32xf32>
    %cst_59 = arith.constant 5.000000e-01 : f32
    %146 = vector.broadcast %cst_59 : f32 to vector<2x32xf32>
    %147 = arith.addf %145, %146 : vector<2x32xf32>
    %148 = arith.mulf %137, %115 : vector<2x32xf32>
    %149 = arith.mulf %129, %139 : vector<2x32xf32>
    %150 = arith.addf %148, %149 : vector<2x32xf32>
    %151 = math.tanh %150 : vector<2x32xf32>
    %152 = arith.mulf %147, %151 : vector<2x32xf32>
    %153 = vector.extract_strided_slice %10 {offsets = [8, 0], sizes = [2, 128], strides = [1, 1]} : vector<16x128xf32> to vector<2x128xf32>
    %c0_60 = arith.constant 0 : index
    %c0_61 = arith.constant 0 : index
    %154 = vector.load %arg6[%c0_60, %c0_61] : memref<32x128xf32, #tpu.memory_space<vmem>>, vector<32x128xf32>
    %cst_62 = arith.constant dense<0.000000e+00> : vector<2x128xf32>
    %155 = tpu.matmul %152, %154, %cst_62 {dimension_numbers = #tpu.dot_dimension_numbers<[1], [0], [0], [1], [0, 0, 1, 1], [], []>} : vector<2x32xf32>, vector<32x128xf32>, vector<2x128xf32> -> vector<2x128xf32>
    %156 = arith.addf %153, %155 : vector<2x128xf32>
    %157 = vector.extract_strided_slice %156 {offsets = [0, 0], sizes = [2, 32], strides = [1, 1]} : vector<2x128xf32> to vector<2x32xf32>
    %cst_63 = arith.constant 5.000000e-01 : f32
    %158 = vector.broadcast %cst_63 : f32 to vector<2x32xf32>
    %159 = arith.mulf %158, %157 : vector<2x32xf32>
    %160 = math.tanh %159 : vector<2x32xf32>
    %cst_64 = arith.constant 5.000000e-01 : f32
    %161 = vector.broadcast %cst_64 : f32 to vector<2x32xf32>
    %162 = arith.mulf %161, %160 : vector<2x32xf32>
    %cst_65 = arith.constant 5.000000e-01 : f32
    %163 = vector.broadcast %cst_65 : f32 to vector<2x32xf32>
    %164 = arith.addf %162, %163 : vector<2x32xf32>
    %165 = vector.extract_strided_slice %156 {offsets = [0, 32], sizes = [2, 32], strides = [1, 1]} : vector<2x128xf32> to vector<2x32xf32>
    %cst_66 = arith.constant 5.000000e-01 : f32
    %166 = vector.broadcast %cst_66 : f32 to vector<2x32xf32>
    %167 = arith.mulf %166, %165 : vector<2x32xf32>
    %168 = math.tanh %167 : vector<2x32xf32>
    %cst_67 = arith.constant 5.000000e-01 : f32
    %169 = vector.broadcast %cst_67 : f32 to vector<2x32xf32>
    %170 = arith.mulf %169, %168 : vector<2x32xf32>
    %cst_68 = arith.constant 5.000000e-01 : f32
    %171 = vector.broadcast %cst_68 : f32 to vector<2x32xf32>
    %172 = arith.addf %170, %171 : vector<2x32xf32>
    %173 = vector.extract_strided_slice %156 {offsets = [0, 64], sizes = [2, 32], strides = [1, 1]} : vector<2x128xf32> to vector<2x32xf32>
    %174 = math.tanh %173 : vector<2x32xf32>
    %175 = vector.extract_strided_slice %156 {offsets = [0, 96], sizes = [2, 32], strides = [1, 1]} : vector<2x128xf32> to vector<2x32xf32>
    %cst_69 = arith.constant 5.000000e-01 : f32
    %176 = vector.broadcast %cst_69 : f32 to vector<2x32xf32>
    %177 = arith.mulf %176, %175 : vector<2x32xf32>
    %178 = math.tanh %177 : vector<2x32xf32>
    %cst_70 = arith.constant 5.000000e-01 : f32
    %179 = vector.broadcast %cst_70 : f32 to vector<2x32xf32>
    %180 = arith.mulf %179, %178 : vector<2x32xf32>
    %cst_71 = arith.constant 5.000000e-01 : f32
    %181 = vector.broadcast %cst_71 : f32 to vector<2x32xf32>
    %182 = arith.addf %180, %181 : vector<2x32xf32>
    %183 = arith.mulf %172, %150 : vector<2x32xf32>
    %184 = arith.mulf %164, %174 : vector<2x32xf32>
    %185 = arith.addf %183, %184 : vector<2x32xf32>
    %186 = math.tanh %185 : vector<2x32xf32>
    %187 = arith.mulf %182, %186 : vector<2x32xf32>
    %188 = vector.extract_strided_slice %10 {offsets = [10, 0], sizes = [2, 128], strides = [1, 1]} : vector<16x128xf32> to vector<2x128xf32>
    %c0_72 = arith.constant 0 : index
    %c0_73 = arith.constant 0 : index
    %189 = vector.load %arg6[%c0_72, %c0_73] : memref<32x128xf32, #tpu.memory_space<vmem>>, vector<32x128xf32>
    %cst_74 = arith.constant dense<0.000000e+00> : vector<2x128xf32>
    %190 = tpu.matmul %187, %189, %cst_74 {dimension_numbers = #tpu.dot_dimension_numbers<[1], [0], [0], [1], [0, 0, 1, 1], [], []>} : vector<2x32xf32>, vector<32x128xf32>, vector<2x128xf32> -> vector<2x128xf32>
    %191 = arith.addf %188, %190 : vector<2x128xf32>
    %192 = vector.extract_strided_slice %191 {offsets = [0, 0], sizes = [2, 32], strides = [1, 1]} : vector<2x128xf32> to vector<2x32xf32>
    %cst_75 = arith.constant 5.000000e-01 : f32
    %193 = vector.broadcast %cst_75 : f32 to vector<2x32xf32>
    %194 = arith.mulf %193, %192 : vector<2x32xf32>
    %195 = math.tanh %194 : vector<2x32xf32>
    %cst_76 = arith.constant 5.000000e-01 : f32
    %196 = vector.broadcast %cst_76 : f32 to vector<2x32xf32>
    %197 = arith.mulf %196, %195 : vector<2x32xf32>
    %cst_77 = arith.constant 5.000000e-01 : f32
    %198 = vector.broadcast %cst_77 : f32 to vector<2x32xf32>
    %199 = arith.addf %197, %198 : vector<2x32xf32>
    %200 = vector.extract_strided_slice %191 {offsets = [0, 32], sizes = [2, 32], strides = [1, 1]} : vector<2x128xf32> to vector<2x32xf32>
    %cst_78 = arith.constant 5.000000e-01 : f32
    %201 = vector.broadcast %cst_78 : f32 to vector<2x32xf32>
    %202 = arith.mulf %201, %200 : vector<2x32xf32>
    %203 = math.tanh %202 : vector<2x32xf32>
    %cst_79 = arith.constant 5.000000e-01 : f32
    %204 = vector.broadcast %cst_79 : f32 to vector<2x32xf32>
    %205 = arith.mulf %204, %203 : vector<2x32xf32>
    %cst_80 = arith.constant 5.000000e-01 : f32
    %206 = vector.broadcast %cst_80 : f32 to vector<2x32xf32>
    %207 = arith.addf %205, %206 : vector<2x32xf32>
    %208 = vector.extract_strided_slice %191 {offsets = [0, 64], sizes = [2, 32], strides = [1, 1]} : vector<2x128xf32> to vector<2x32xf32>
    %209 = math.tanh %208 : vector<2x32xf32>
    %210 = vector.extract_strided_slice %191 {offsets = [0, 96], sizes = [2, 32], strides = [1, 1]} : vector<2x128xf32> to vector<2x32xf32>
    %cst_81 = arith.constant 5.000000e-01 : f32
    %211 = vector.broadcast %cst_81 : f32 to vector<2x32xf32>
    %212 = arith.mulf %211, %210 : vector<2x32xf32>
    %213 = math.tanh %212 : vector<2x32xf32>
    %cst_82 = arith.constant 5.000000e-01 : f32
    %214 = vector.broadcast %cst_82 : f32 to vector<2x32xf32>
    %215 = arith.mulf %214, %213 : vector<2x32xf32>
    %cst_83 = arith.constant 5.000000e-01 : f32
    %216 = vector.broadcast %cst_83 : f32 to vector<2x32xf32>
    %217 = arith.addf %215, %216 : vector<2x32xf32>
    %218 = arith.mulf %207, %185 : vector<2x32xf32>
    %219 = arith.mulf %199, %209 : vector<2x32xf32>
    %220 = arith.addf %218, %219 : vector<2x32xf32>
    %221 = math.tanh %220 : vector<2x32xf32>
    %222 = arith.mulf %217, %221 : vector<2x32xf32>
    %223 = vector.extract_strided_slice %10 {offsets = [12, 0], sizes = [2, 128], strides = [1, 1]} : vector<16x128xf32> to vector<2x128xf32>
    %c0_84 = arith.constant 0 : index
    %c0_85 = arith.constant 0 : index
    %224 = vector.load %arg6[%c0_84, %c0_85] : memref<32x128xf32, #tpu.memory_space<vmem>>, vector<32x128xf32>
    %cst_86 = arith.constant dense<0.000000e+00> : vector<2x128xf32>
    %225 = tpu.matmul %222, %224, %cst_86 {dimension_numbers = #tpu.dot_dimension_numbers<[1], [0], [0], [1], [0, 0, 1, 1], [], []>} : vector<2x32xf32>, vector<32x128xf32>, vector<2x128xf32> -> vector<2x128xf32>
    %226 = arith.addf %223, %225 : vector<2x128xf32>
    %227 = vector.extract_strided_slice %226 {offsets = [0, 0], sizes = [2, 32], strides = [1, 1]} : vector<2x128xf32> to vector<2x32xf32>
    %cst_87 = arith.constant 5.000000e-01 : f32
    %228 = vector.broadcast %cst_87 : f32 to vector<2x32xf32>
    %229 = arith.mulf %228, %227 : vector<2x32xf32>
    %230 = math.tanh %229 : vector<2x32xf32>
    %cst_88 = arith.constant 5.000000e-01 : f32
    %231 = vector.broadcast %cst_88 : f32 to vector<2x32xf32>
    %232 = arith.mulf %231, %230 : vector<2x32xf32>
    %cst_89 = arith.constant 5.000000e-01 : f32
    %233 = vector.broadcast %cst_89 : f32 to vector<2x32xf32>
    %234 = arith.addf %232, %233 : vector<2x32xf32>
    %235 = vector.extract_strided_slice %226 {offsets = [0, 32], sizes = [2, 32], strides = [1, 1]} : vector<2x128xf32> to vector<2x32xf32>
    %cst_90 = arith.constant 5.000000e-01 : f32
    %236 = vector.broadcast %cst_90 : f32 to vector<2x32xf32>
    %237 = arith.mulf %236, %235 : vector<2x32xf32>
    %238 = math.tanh %237 : vector<2x32xf32>
    %cst_91 = arith.constant 5.000000e-01 : f32
    %239 = vector.broadcast %cst_91 : f32 to vector<2x32xf32>
    %240 = arith.mulf %239, %238 : vector<2x32xf32>
    %cst_92 = arith.constant 5.000000e-01 : f32
    %241 = vector.broadcast %cst_92 : f32 to vector<2x32xf32>
    %242 = arith.addf %240, %241 : vector<2x32xf32>
    %243 = vector.extract_strided_slice %226 {offsets = [0, 64], sizes = [2, 32], strides = [1, 1]} : vector<2x128xf32> to vector<2x32xf32>
    %244 = math.tanh %243 : vector<2x32xf32>
    %245 = vector.extract_strided_slice %226 {offsets = [0, 96], sizes = [2, 32], strides = [1, 1]} : vector<2x128xf32> to vector<2x32xf32>
    %cst_93 = arith.constant 5.000000e-01 : f32
    %246 = vector.broadcast %cst_93 : f32 to vector<2x32xf32>
    %247 = arith.mulf %246, %245 : vector<2x32xf32>
    %248 = math.tanh %247 : vector<2x32xf32>
    %cst_94 = arith.constant 5.000000e-01 : f32
    %249 = vector.broadcast %cst_94 : f32 to vector<2x32xf32>
    %250 = arith.mulf %249, %248 : vector<2x32xf32>
    %cst_95 = arith.constant 5.000000e-01 : f32
    %251 = vector.broadcast %cst_95 : f32 to vector<2x32xf32>
    %252 = arith.addf %250, %251 : vector<2x32xf32>
    %253 = arith.mulf %242, %220 : vector<2x32xf32>
    %254 = arith.mulf %234, %244 : vector<2x32xf32>
    %255 = arith.addf %253, %254 : vector<2x32xf32>
    %256 = math.tanh %255 : vector<2x32xf32>
    %257 = arith.mulf %252, %256 : vector<2x32xf32>
    %258 = vector.extract_strided_slice %10 {offsets = [14, 0], sizes = [2, 128], strides = [1, 1]} : vector<16x128xf32> to vector<2x128xf32>
    %c0_96 = arith.constant 0 : index
    %c0_97 = arith.constant 0 : index
    %259 = vector.load %arg6[%c0_96, %c0_97] : memref<32x128xf32, #tpu.memory_space<vmem>>, vector<32x128xf32>
    %cst_98 = arith.constant dense<0.000000e+00> : vector<2x128xf32>
    %260 = tpu.matmul %257, %259, %cst_98 {dimension_numbers = #tpu.dot_dimension_numbers<[1], [0], [0], [1], [0, 0, 1, 1], [], []>} : vector<2x32xf32>, vector<32x128xf32>, vector<2x128xf32> -> vector<2x128xf32>
    %261 = arith.addf %258, %260 : vector<2x128xf32>
    %262 = vector.extract_strided_slice %261 {offsets = [0, 0], sizes = [2, 32], strides = [1, 1]} : vector<2x128xf32> to vector<2x32xf32>
    %cst_99 = arith.constant 5.000000e-01 : f32
    %263 = vector.broadcast %cst_99 : f32 to vector<2x32xf32>
    %264 = arith.mulf %263, %262 : vector<2x32xf32>
    %265 = math.tanh %264 : vector<2x32xf32>
    %cst_100 = arith.constant 5.000000e-01 : f32
    %266 = vector.broadcast %cst_100 : f32 to vector<2x32xf32>
    %267 = arith.mulf %266, %265 : vector<2x32xf32>
    %cst_101 = arith.constant 5.000000e-01 : f32
    %268 = vector.broadcast %cst_101 : f32 to vector<2x32xf32>
    %269 = arith.addf %267, %268 : vector<2x32xf32>
    %270 = vector.extract_strided_slice %261 {offsets = [0, 32], sizes = [2, 32], strides = [1, 1]} : vector<2x128xf32> to vector<2x32xf32>
    %cst_102 = arith.constant 5.000000e-01 : f32
    %271 = vector.broadcast %cst_102 : f32 to vector<2x32xf32>
    %272 = arith.mulf %271, %270 : vector<2x32xf32>
    %273 = math.tanh %272 : vector<2x32xf32>
    %cst_103 = arith.constant 5.000000e-01 : f32
    %274 = vector.broadcast %cst_103 : f32 to vector<2x32xf32>
    %275 = arith.mulf %274, %273 : vector<2x32xf32>
    %cst_104 = arith.constant 5.000000e-01 : f32
    %276 = vector.broadcast %cst_104 : f32 to vector<2x32xf32>
    %277 = arith.addf %275, %276 : vector<2x32xf32>
    %278 = vector.extract_strided_slice %261 {offsets = [0, 64], sizes = [2, 32], strides = [1, 1]} : vector<2x128xf32> to vector<2x32xf32>
    %279 = math.tanh %278 : vector<2x32xf32>
    %280 = vector.extract_strided_slice %261 {offsets = [0, 96], sizes = [2, 32], strides = [1, 1]} : vector<2x128xf32> to vector<2x32xf32>
    %cst_105 = arith.constant 5.000000e-01 : f32
    %281 = vector.broadcast %cst_105 : f32 to vector<2x32xf32>
    %282 = arith.mulf %281, %280 : vector<2x32xf32>
    %283 = math.tanh %282 : vector<2x32xf32>
    %cst_106 = arith.constant 5.000000e-01 : f32
    %284 = vector.broadcast %cst_106 : f32 to vector<2x32xf32>
    %285 = arith.mulf %284, %283 : vector<2x32xf32>
    %cst_107 = arith.constant 5.000000e-01 : f32
    %286 = vector.broadcast %cst_107 : f32 to vector<2x32xf32>
    %287 = arith.addf %285, %286 : vector<2x32xf32>
    %288 = arith.mulf %277, %255 : vector<2x32xf32>
    %289 = arith.mulf %269, %279 : vector<2x32xf32>
    %290 = arith.addf %288, %289 : vector<2x32xf32>
    %291 = math.tanh %290 : vector<2x32xf32>
    %292 = arith.mulf %287, %291 : vector<2x32xf32>
    %293 = tpu.concatenate %47, %82, %117, %152, %187, %222, %257, %292 in 0 : vector<2x32xf32>, vector<2x32xf32>, vector<2x32xf32>, vector<2x32xf32>, vector<2x32xf32>, vector<2x32xf32>, vector<2x32xf32>, vector<2x32xf32> -> vector<16x32xf32>
    tpu.wait_dma2 semaphore(%arg11 : memref<!tpu.dma_semaphore, #tpu.memory_space<semaphore_mem>>) src(%arg8 : memref<32x128xf32, #tpu.memory_space<any>>) dst(%arg10 : memref<32x128xf32, #tpu.memory_space<vmem>>)
    %c0_108 = arith.constant 0 : index
    %c0_109 = arith.constant 0 : index
    %294 = vector.load %arg10[%c0_108, %c0_109] : memref<32x128xf32, #tpu.memory_space<vmem>>, vector<32x128xf32>
    %cst_110 = arith.constant dense<0.000000e+00> : vector<16x128xf32>
    %295 = tpu.matmul %293, %294, %cst_110 {dimension_numbers = #tpu.dot_dimension_numbers<[1], [0], [0], [1], [0, 0, 1, 1], [], []>} : vector<16x32xf32>, vector<32x128xf32>, vector<16x128xf32> -> vector<16x128xf32>
    %c0_111 = arith.constant 0 : index
    %c0_112 = arith.constant 0 : index
    %296 = vector.load %arg7[%c0_111, %c0_112] : memref<1x128xf32, #tpu.memory_space<vmem>>, vector<1x128xf32>
    %297 = vector.broadcast %296 : vector<1x128xf32> to vector<16x128xf32>
    %298 = arith.addf %295, %297 : vector<16x128xf32>
    %c0_113 = arith.constant 0 : index
    %c0_114 = arith.constant 0 : index
    %299 = vector.load %arg9[%c0_113, %c0_114] : memref<16x128xf32, #tpu.memory_space<vmem>>, vector<16x128xf32>
    tpu.vector_store %arg9[%c0_113, %c0_114], %298 {strides = array<i32>} : memref<16x128xf32, #tpu.memory_space<vmem>>, vector<16x128xf32>,
    return
  }
  func.func @transform_0(%arg0: i32) -> (i32, i32) {
    %c0_i32 = arith.constant 0 : i32
    %c0_i32_0 = arith.constant 0 : i32
    return %arg0, %c0_i32 : i32, i32
  }
  func.func @transform_1(%arg0: i32) -> (i32, i32) {
    %c0_i32 = arith.constant 0 : i32
    %c0_i32_0 = arith.constant 0 : i32
    %c0_i32_1 = arith.constant 0 : i32
    return %c0_i32, %c0_i32_0 : i32, i32
  }
  func.func @transform_2(%arg0: i32) -> (i32, i32) {
    %c0_i32 = arith.constant 0 : i32
    %c0_i32_0 = arith.constant 0 : i32
    %c0_i32_1 = arith.constant 0 : i32
    return %c0_i32, %c0_i32_0 : i32, i32
  }
  func.func @transform_3(%arg0: i32) -> (i32, i32) {
    %c0_i32 = arith.constant 0 : i32
    %c0_i32_0 = arith.constant 0 : i32
    %c0_i32_1 = arith.constant 0 : i32
    return %c0_i32, %c0_i32_0 : i32, i32
  }
  func.func @transform_4(%arg0: i32) -> (i32, i32) {
    %c0_i32 = arith.constant 0 : i32
    %c0_i32_0 = arith.constant 0 : i32
    %c0_i32_1 = arith.constant 0 : i32
    return %c0_i32, %c0_i32_0 : i32, i32
  }
  func.func @transform_5(%arg0: i32) -> (i32, i32) {
    %c0_i32 = arith.constant 0 : i32
    %c0_i32_0 = arith.constant 0 : i32
    %c0_i32_1 = arith.constant 0 : i32
    return %c0_i32, %c0_i32_0 : i32, i32
  }
  func.func @transform_6(%arg0: i32) -> (i32, i32) {
    %c0_i32 = arith.constant 0 : i32
    %c0_i32_0 = arith.constant 0 : i32
    %c0_i32_1 = arith.constant 0 : i32
    return %c0_i32, %c0_i32_0 : i32, i32
  }
  func.func @transform_8(%arg0: i32) -> (i32, i32) {
    %c0_i32 = arith.constant 0 : i32
    %c0_i32_0 = arith.constant 0 : i32
    return %arg0, %c0_i32 : i32, i32
  }
}

</mosaic_0001>

<bundles_post_ra>
// kernel: generator_forward.1
= control target key start
LH: loop header
LB: loop body
LE: loop exit
PB: predicated region body
PF: predicated region fallthrough
CT: control target
= control target key end

     0   :  { %13 = vsyncpa [#allocation5], 0  ;;  %s1913_s0 = inlined_call_operand.vmem [shape: f32[16,16], index: 0, kind: input, shape index: {}]   ;;  %s1914_s1 = inlined_call_operand.hbm [shape: f32[16,43], index: 1, kind: input, shape index: {}]   ;;  %s1915_s2 = inlined_call_operand.vmem [shape: f32[1,43], index: 2, kind: input, shape index: {}]   ;;  %s1916_s3 = inlined_call_operand.hbm [shape: f32[43,128], index: 3, kind: input, shape index: {}]   ;;  %s1917_s4 = inlined_call_operand.vmem [shape: f32[1,128], index: 4, kind: input, shape index: {}]   ;;  %s1918_s5 = inlined_call_operand.hbm [shape: f32[32,128], index: 5, kind: input, shape index: {}]   ;;  %s1919_s6 = inlined_call_operand.vmem [shape: f32[1,128], index: 6, kind: input, shape index: {}]   ;;  %s1920_s7 = inlined_call_operand.hbm [shape: f32[32,128], index: 7, kind: input, shape index: {}]   ;;  %s1921_s8 = inlined_call_operand.vmem [shape: f32[16,128], index: 8, kind: output, shape index: {}]  }
   0x1   :  { %14 = vsyncpa [#allocation7], 0  ;;  %s1649_s27 = smov [#allocation6]   ;;  %s1650_s29 = smov [#allocation4]  }
   0x2   :  { %s36_s28 = sshll.u32 %s1649_s27, 4  ;;  %s22_s30 = sshll.u32 %s1650_s29, 4  ;;  %s37_s28 = int_to_ptr.vmem [resolvable:$true] %s36_s28  ;;  %s1706_s30 = int_to_ptr.vmem [resolvable:$true] %s22_s30 }
   0x3   :  { %s1555_s11 = scalar_lea.hbm %s1916_s3, 768 }
   0x4   :  { %p1556_p0 = scmp.ne.s32.totalorder %s1916_s3, %s1555_s11  ;;  %p1559_p1 = scmp.lt.u32.totalorder %s1555_s11, %s1916_s3 }
   0x6   :  { %p1561_p2 = pnand %p1559_p1, %p1556_p0 }
   0x8   :  { %1564 = shalt.err (!%p1561_p2)
}
   0x9   :  { %s1565_s16 = scalar_lea.vmem %s37_s28, 768  ;;  %p1570_p4 = scmp.lt.s32.totalorder %s37_s28, %s37_s28 }
   0xa   :  { %p1566_p3 = scmp.ne.s32.totalorder %s37_s28, %s1565_s16  ;;  %p1571_p5 = scmp.lt.s32.totalorder %s1565_s16, %s1565_s16 }
   0xc   :  { %p1572_p6 = por %p1571_p5, %p1570_p4 }
   0xe   :  { %p1573_p7 = pnand %p1572_p6, %p1566_p3 }
  0x10   :  { %1576 = shalt.err (!%p1573_p7)
}
  0x11   :  { %s1651_s17 = smov 128   ;;  %s1652_s18 = smov 8  }
  0x12   :  { %42 = dma.hbm_to_vmem [thread:$0]  %s1916_s3, 768, %s37_s28, [#allocation7], %s1651_s17, %s1651_s17, %s1652_s18  }
  0x13   :  { %s1577_s23 = scalar_lea.hbm %s1914_s1, 256 }
  0x14   :  { %p1578_p8 = scmp.ne.s32.totalorder %s1914_s1, %s1577_s23  ;;  %p1581_p9 = scmp.lt.u32.totalorder %s1577_s23, %s1914_s1 }
  0x16   :  { %p1583_p10 = pnand %p1581_p9, %p1578_p8 }
  0x18   :  { %1586 = shalt.err (!%p1583_p10)
}
  0x19   :  { %s1587_s29 = scalar_lea.vmem %s1706_s30, 256  ;;  %p1592_p12 = scmp.lt.s32.totalorder %s1706_s30, %s1706_s30 }
  0x1a   :  { %p1588_p11 = scmp.ne.s32.totalorder %s1706_s30, %s1587_s29  ;;  %p1593_p13 = scmp.lt.s32.totalorder %s1587_s29, %s1587_s29 }
  0x1c   :  { %p1594_p0 = por %p1593_p13, %p1592_p12 }
  0x1e   :  { %p1595_p1 = pnand %p1594_p0, %p1588_p11 }
  0x20   :  { %1598 = shalt.err (!%p1595_p1)
}
  0x21   :  { %28 = dma.hbm_to_vmem [thread:$0]  %s1914_s1, 256, %s1706_s30, [#allocation5], %s1651_s17, %s1651_s17, %s1652_s18  }
  0x22   :  { %s1653_s9 = smov [#allocation8]   ;;  %s1599_s13 = scalar_lea.hbm %s1918_s5, 512 }
  0x23   :  { %s50_s10 = sshll.u32 %s1653_s9, 4  ;;  %p1600_p2 = scmp.ne.s32.totalorder %s1918_s5, %s1599_s13  ;;  %s51_s10 = int_to_ptr.vmem [resolvable:$true] %s50_s10 }
  0x24   :  { %p1603_p3 = scmp.lt.u32.totalorder %s1599_s13, %s1918_s5 }
  0x26   :  { %p1605_p4 = pnand %p1603_p3, %p1600_p2 }
  0x28   :  { %1608 = shalt.err (!%p1605_p4)
}
  0x29   :  { %s1609_s20 = scalar_lea.vmem %s51_s10, 512  ;;  %p1614_p6 = scmp.lt.s32.totalorder %s51_s10, %s51_s10 }
  0x2a   :  { %p1610_p5 = scmp.ne.s32.totalorder %s51_s10, %s1609_s20  ;;  %p1615_p7 = scmp.lt.s32.totalorder %s1609_s20, %s1609_s20 }
  0x2c   :  { %p1616_p8 = por %p1615_p7, %p1614_p6 }
  0x2e   :  { %p1617_p9 = pnand %p1616_p8, %p1610_p5 }
  0x30   :  { %1620 = shalt.err (!%p1617_p9)
}
  0x31   :  { %56 = dma.hbm_to_vmem [thread:$0]  %s1918_s5, 512, %s51_s10, [#allocation7], %s1651_s17, %s1651_s17, %s1652_s18  }
  0x32   :  { %1643 = dma.done.wait [#allocation5], 256  }
  0x33   :  { %1644 = vsyncadd [#allocation5], 4294967040 }
  0x34   :  { %1645 = dma.done.wait [#allocation7], 1280  }
  0x35   :  { %1646 = vsyncadd [#allocation7], 4294966016  ;;  %vm90_vm0 = vcmask 130048   ;;  %v81_v0 = vld [vmem:[#allocation4] sm:$0xff]  ;;  %v82_v1 = vld [vmem:[#allocation4 + $0x8] sm:$0xff]  ;;  %v1654_v11 = vmov 0.0|0.0  }
  0x36   :  { %v79_v2 = vld [vmem:[%s1913_s0] sm:$0xff]  ;;  %v1421_v3 = vpack.c.bf16 %v82_v1, %v81_v0  ;;  %v172_v4 = vld [vmem:[#allocation6] sm:$0xff]  ;;  %v173_v5 = vld [vmem:[#allocation6 + $0x8] sm:$0xff]  ;;  %vm192_vm1 = vcmask 1042432   ;;  %vm1655_vm2 = vmmov 1   ;;  %vm1656_vm4 = vmmov 0  }
  0x37   :  { %1304 = vmatprep.mubr.msk.f32.mxu0 %vm90_vm0, %v79_v2  ;;  %v1425_v6 = vpack.c.bf16 %v173_v5, %v172_v4  ;;  %v174_v7 = vld [vmem:[#allocation6 + $0x10] sm:$0xff]  ;;  %v175_v8 = vld [vmem:[#allocation6 + $0x18] sm:$0xff]  ;;  %v176_v15 = vld [vmem:[#allocation6 + $0x20] sm:$0xff]  ;;  %v1657_v21 = vmov 0.0   ;;  %vm185_vm5 = vcmask 351232   ;;  %s1658_s24 = smov 64  }
  0x38   :  { %1422 = vmatprep.subr.bf16.mxu0 %v1421_v3  ;;  %v1429_v9 = vpack.c.bf16 %v175_v8, %v174_v7  ;;  %v80_v10 = vld [vmem:[%s1913_s0 + $0x8] sm:$0xff]  ;;  %v271_v12 = vld [vmem:[#allocation8] sm:$0xff]  ;;  %v177_v16 = vld [vmem:[#allocation6 + $0x28] sm:$0x7]  ;;  %vm275_vm6 = vcmask 261120   ;;  %vm1102_vm7 = vcmask 1041408  }
  0x39   :  { %1424 = vmatpush3.bf16.msra.mxu0 %v1421_v3  ;;  %1426 = vmatprep.subr.bf16.mxu1 %v1425_v6  ;;  %v272_v13 = vld [vmem:[#allocation8 + $0x8] sm:$0xff]  ;;  %v1433_v17 = vpack.c.bf16 %v177_v16, %v176_v15  ;;  %vm1434_vm3 = vmpackc.low %vm192_vm1, %vm1655_vm2  ;;  %v273_v18 = vld [vmem:[#allocation8 + $0x10] sm:$0xff]  ;;  %vm1104_vm8 = vcmask 1043456   ;;  %vm1106_vm9 = vcmask 1045504   ;;  %s1660_s25 = smov [#allocation2]   ;;  %s1621_s3 = scalar_lea.hbm %s1920_s7, 512 }
  0x3a   :  { %1428 = vmatpush3.bf16.msra.mxu1 %v1425_v6  ;;  %1439 = vmatprep.subr.bf16.mxu0 %v1654_v11  ;;  %v1767_v14 = vpack.c.bf16 %v272_v13, %v271_v12  ;;  %v274_v19 = vld [vmem:[#allocation8 + $0x18] sm:$0xff]  ;;  %v1224_v22 = vld [vmem:[%s1915_s2] ss:$0 sm:$0xff]  ;;  %s75_s26 = sshll.u32 %s1660_s25, 4  ;;  %p1622_p10 = scmp.ne.s32.totalorder %s1920_s7, %s1621_s3  ;;  %s76_s26 = int_to_ptr.vmem [resolvable:$true] %s75_s26 }
  0x3b   :  { %1430 = vmatprep.subr.bf16.mxu1 %v1429_v9  ;;  %v1771_v20 = vpack.c.bf16 %v274_v19, %v273_v18  ;;  %v1227_v29 = vld [vmem:[%s1917_s4] ss:$0 sm:$0xff]  ;;  %s1659_s4 = smov 32   ;;  %p1625_p11 = scmp.lt.u32.totalorder %s1621_s3, %s1920_s7 }
  0x3c   :  { %1305 = vmatmul.mubr.msk.f32.vlgmr.msra.gmra.mrb[0].mxu0 %vm90_vm0, %v80_v10 }
  0x3d   :  { %1441 = vmatpush3.bf16.msra.mxu0 %v1767_v14  ;;  %1330 = vmatprep.mubr.msk.f32.mxu0 %vm1656_vm4, %v1657_v21  ;;  %p1627_p12 = pnand %p1625_p11, %p1622_p10 }
  0x3e   :  { %1432 = vmatpush3.bf16.msra.mxu1 %v1429_v9  ;;  %1442 = vmatprep.subr.bf16.mxu0 %v1654_v11 }
  0x3f   :  { %1435 = vmatprep.subr.msk.bf16.mxu1 %vm1434_vm3, %v1433_v17 }
  0x41   :  { %1444 = vmatpush3.bf16.msra.mxu0 %v1771_v20 }
  0x42   :  { %1438 = vmatpush3.bf16.msk.msra.mxu1 %vm1434_vm3, %v1433_v17  ;;  %1445 = vmatprep.subr.bf16.mxu0 %v1654_v11 }
  0x43   :  { %1451 = vmatprep.subr.bf16.mxu1 %v1654_v11 }
  0x44   :  { %1331 = vmatmul.mubr.f32.vlgmr.msra.gmra.mrb[2].mxu0 %v1657_v21 }
  0x45   :  { %1447 = vmatpush3.bf16.msra.mxu0 %v1767_v14  ;;  %1341 = vmatprep.mubr.msk.f32.mxu0 %vm1656_vm4, %v1657_v21 }
  0x46   :  { %1448 = vmatprep.subr.bf16.mxu0 %v1654_v11 }
  0x49   :  { %1450 = vmatpush3.bf16.msra.mxu0 %v1771_v20 }
  0x4a   :  { %1457 = vmatprep.subr.bf16.mxu0 %v1654_v11 }
 0x10f   :  { %v1306_v23 = vpop.f32.mrb[0].mxu0 }
 0x110   :  { %v163_v24 = vpop.f32.mrb[1].mxu0  ;;  %v169_v26 = vadd.f32 %v1306_v23, %v1224_v22 }
 0x111   :  { %v164_v25 = vadd.f32 %v1224_v22, %v163_v24 }
 0x113   :  { %1319 = vmatprep.mubr.msk.f32.mxu1 %vm185_vm5, %v164_v25 }
 0x114   :  { %1320 = vmatmul.mubr.msk.f32.vlgmr.msra.gmra.mrb[0].mxu1 %vm185_vm5, %v169_v26 }
 0x115   :  { %1453 = vmatpush3.bf16.msra.mxu1 %v1767_v14  ;;  %1352 = vmatprep.mubr.msk.f32.mxu1 %vm1656_vm4, %v1657_v21 }
 0x116   :  { %1454 = vmatprep.subr.bf16.mxu1 %v1654_v11 }
 0x117   :  { %v345_v27 = vpop.f32.mrb[2].mxu0 }
 0x118   :  { %v1332_v28 = vpop.f32.mrb[3].mxu0 }
 0x119   :  { %1456 = vmatpush3.bf16.msra.mxu1 %v1771_v20 }
 0x11a   :  { %1463 = vmatprep.subr.bf16.mxu1 %v1654_v11 }
 0x1e7   :  { %v1321_v30 = vpop.f32.mrb[0].mxu1 }
 0x1e8   :  { %v1797_v31 = vadd.f32 %v1321_v30, %v1227_v29  ;;  %v262_v32 = vpop.f32.mrb[1].mxu1 }
 0x1e9   :  { %v1799_v33 = vadd.f32 %v1227_v29, %v262_v32 }
 0x1eb   :  { %v349_v34 = vadd.f32 %v345_v27, %v1799_v33 }
 0x1ed   :  { %1507 = vtanh.f32 %v349_v34  ;;  %v350_v36 = vmul.f32 0.5, %v349_v34 }
 0x1ef   :  { %1509 = vtanh.f32 %v350_v36 }
 0x1f7   :  { %v1508_v35 = vpop.eup %1507 }
 0x1f8   :  { %357 = vrot.lane.b32.xlu0 %v1508_v35, %s1658_s24 }
 0x1f9   :  { %v1510_v37 = vpop.eup %1509 }
 0x1fa   :  { %v352_v38 = vmul.f32 0.5, %v1510_v37 }
 0x1fc   :  { %v353_v39 = vadd.f32 0.5, %v352_v38 }
 0x1fe   :  { %v355_v42 = vmul.f32 0.0, %v353_v39 }
 0x26a   :  { %v358_v40 = vpop.permute.xlu0 %357 }
 0x26b   :  { %v360_v41 = vmul.f32 %v358_v40, %v353_v39 }
 0x26d   :  { %362 = vrot.lane.b32.xlu0 %v360_v41, %s1659_s4 }
 0x2df   :  { %v363_v43 = vpop.permute.xlu0 %362 }
 0x2e0   :  { %v365_v44 = vadd.f32 %v363_v43, %v355_v42 }
 0x2e2   :  { %1511 = vtanh.f32 %v365_v44  ;;  %v457_v60 = vrot.slane %v365_v44, 6 }
 0x2ec   :  { %v1512_v45 = vpop.eup %1511 }
 0x2ed   :  { %368 = vrot.lane.b32.xlu1 %v1512_v45, %s1658_s24 }
 0x35f   :  { %v369_v46 = vpop.permute.xlu1 %368 }
 0x360   :  { %v1805_v47 = vmul.f32 %v369_v46, %v353_v39 }
 0x362   :  { %373 = vrot.lane.b32.xlu1 %v1805_v47, %s1659_s4 }
 0x3d4   :  { %v374_v48 = vpop.permute.xlu1 %373 }
 0x3d5   :  { %1342 = vmatmul.mubr.msk.f32.vlgmr.msra.gmra.mrb[4].mxu0 %vm275_vm6, %v374_v48 }
 0x3d6   :  { %1459 = vmatpush3.bf16.msra.mxu0 %v1767_v14  ;;  %1363 = vmatprep.mubr.msk.f32.mxu0 %vm1656_vm4, %v1657_v21 }
 0x3d7   :  { %1460 = vmatprep.subr.bf16.mxu0 %v1654_v11 }
 0x3da   :  { %1462 = vmatpush3.bf16.msra.mxu0 %v1771_v20 }
 0x3db   :  { %1469 = vmatprep.subr.bf16.mxu0 %v1654_v11 }
 0x4a8   :  { %v443_v49 = vpop.f32.mrb[4].mxu0 }
 0x4a9   :  { %v448_v50 = vrot.slane %v443_v49, 6  ;;  %v1343_v51 = vpop.f32.mrb[5].mxu0 }
 0x4ab   :  { %v450_v52 = vadd.f32 %v448_v50, %v1799_v33 }
 0x4ad   :  { %1513 = vtanh.f32 %v450_v52  ;;  %v451_v54 = vmul.f32 0.5, %v450_v52 }
 0x4af   :  { %1515 = vtanh.f32 %v451_v54 }
 0x4b7   :  { %v1514_v53 = vpop.eup %1513 }
 0x4b8   :  { %461 = vrot.lane.b32.xlu0 %v1514_v53, %s1658_s24 }
 0x4b9   :  { %v1516_v55 = vpop.eup %1515 }
 0x4ba   :  { %v453_v56 = vmul.f32 0.5, %v1516_v55 }
 0x4bc   :  { %v454_v57 = vadd.f32 0.5, %v453_v56 }
 0x4be   :  { %v459_v61 = vmul.f32 %v457_v60, %v454_v57 }
 0x52a   :  { %v462_v58 = vpop.permute.xlu0 %461 }
 0x52b   :  { %v464_v59 = vmul.f32 %v462_v58, %v454_v57 }
 0x52d   :  { %466 = vrot.lane.b32.xlu1 %v464_v59, %s1659_s4 }
 0x59f   :  { %v467_v62 = vpop.permute.xlu1 %466 }
 0x5a0   :  { %v469_v63 = vadd.f32 %v467_v62, %v459_v61 }
 0x5a2   :  { %1517 = vtanh.f32 %v469_v63  ;;  %v562_v18 = vrot.slane %v469_v63, 6 }
 0x5ac   :  { %v1518_v0 = vpop.eup %1517 }
 0x5ad   :  { %472 = vrot.lane.b32.xlu0 %v1518_v0, %s1658_s24 }
 0x61f   :  { %v473_v1 = vpop.permute.xlu0 %472 }
 0x620   :  { %v475_v2 = vmul.f32 %v473_v1, %v454_v57 }
 0x622   :  { %v477_v3 = vrot.slane %v475_v2, 2  ;;  %v1103_v27 = vsel %vm1102_vm7, %v1805_v47, %v475_v2 }
 0x624   :  { %478 = vrot.lane.b32.xlu1 %v477_v3, %s1659_s4 }
 0x696   :  { %v479_v4 = vpop.permute.xlu1 %478 }
 0x697   :  { %1353 = vmatmul.mubr.msk.f32.vlgmr.msra.gmra.mrb[2].mxu1 %vm275_vm6, %v479_v4 }
 0x698   :  { %1465 = vmatpush3.bf16.msra.mxu1 %v1767_v14  ;;  %1374 = vmatprep.mubr.msk.f32.mxu1 %vm1656_vm4, %v1657_v21 }
 0x699   :  { %1466 = vmatprep.subr.bf16.mxu1 %v1654_v11 }
 0x69c   :  { %1468 = vmatpush3.bf16.msra.mxu1 %v1771_v20 }
 0x69d   :  { %1475 = vmatprep.subr.bf16.mxu1 %v1654_v11 }
 0x76a   :  { %v548_v5 = vpop.f32.mrb[2].mxu1 }
 0x76b   :  { %v553_v6 = vrot.slane %v548_v5, 4  ;;  %v1354_v7 = vpop.f32.mrb[3].mxu1 }
 0x76d   :  { %v555_v8 = vadd.f32 %v553_v6, %v1799_v33 }
 0x76f   :  { %1519 = vtanh.f32 %v555_v8  ;;  %v556_v10 = vmul.f32 0.5, %v555_v8 }
 0x771   :  { %1521 = vtanh.f32 %v556_v10 }
 0x779   :  { %v1520_v9 = vpop.eup %1519 }
 0x77a   :  { %566 = vrot.lane.b32.xlu0 %v1520_v9, %s1658_s24 }
 0x77b   :  { %v1522_v12 = vpop.eup %1521 }
 0x77c   :  { %v558_v13 = vmul.f32 0.5, %v1522_v12 }
 0x77e   :  { %v559_v15 = vadd.f32 0.5, %v558_v13 }
 0x780   :  { %v564_v19 = vmul.f32 %v562_v18, %v559_v15 }
 0x7ec   :  { %v567_v16 = vpop.permute.xlu0 %566 }
 0x7ed   :  { %v569_v17 = vmul.f32 %v567_v16, %v559_v15 }
 0x7ef   :  { %571 = vrot.lane.b32.xlu1 %v569_v17, %s1659_s4 }
 0x861   :  { %v572_v22 = vpop.permute.xlu1 %571 }
 0x862   :  { %v574_v23 = vadd.f32 %v572_v22, %v564_v19 }
 0x864   :  { %1523 = vtanh.f32 %v574_v23  ;;  %v667_v44 = vrot.slane %v574_v23, 6 }
 0x86e   :  { %v1524_v24 = vpop.eup %1523 }
 0x86f   :  { %577 = vrot.lane.b32.xlu0 %v1524_v24, %s1658_s24 }
 0x8e1   :  { %v578_v25 = vpop.permute.xlu0 %577 }
 0x8e2   :  { %v580_v26 = vmul.f32 %v578_v25, %v559_v15 }
 0x8e4   :  { %v582_v28 = vrot.slane %v580_v26, 4  ;;  %v1105_v29 = vsel %vm1104_vm8, %v1103_v27, %v580_v26 }
 0x8e6   :  { %583 = vrot.lane.b32.xlu1 %v582_v28, %s1659_s4 }
 0x958   :  { %v584_v30 = vpop.permute.xlu1 %583 }
 0x959   :  { %1364 = vmatmul.mubr.msk.f32.vlgmr.msra.gmra.mrb[6].mxu0 %vm275_vm6, %v584_v30 }
 0x95a   :  { %1471 = vmatpush3.bf16.msra.mxu0 %v1767_v14  ;;  %1385 = vmatprep.mubr.msk.f32.mxu0 %vm1656_vm4, %v1657_v21 }
 0x95b   :  { %1472 = vmatprep.subr.bf16.mxu0 %v1654_v11 }
 0x95e   :  { %1474 = vmatpush3.bf16.msra.mxu0 %v1771_v20 }
 0x95f   :  { %1481 = vmatprep.subr.bf16.mxu0 %v1654_v11 }
 0xa2c   :  { %v653_v32 = vpop.f32.mrb[6].mxu0 }
 0xa2d   :  { %v658_v34 = vrot.slane %v653_v32, 2  ;;  %v1365_v35 = vpop.f32.mrb[7].mxu0 }
 0xa2f   :  { %v660_v36 = vadd.f32 %v658_v34, %v1799_v33 }
 0xa31   :  { %1525 = vtanh.f32 %v660_v36  ;;  %v661_v38 = vmul.f32 0.5, %v660_v36 }
 0xa33   :  { %1527 = vtanh.f32 %v661_v38 }
 0xa3b   :  { %v1526_v37 = vpop.eup %1525 }
 0xa3c   :  { %671 = vrot.lane.b32.xlu0 %v1526_v37, %s1658_s24 }
 0xa3d   :  { %v1528_v39 = vpop.eup %1527 }
 0xa3e   :  { %v663_v40 = vmul.f32 0.5, %v1528_v39 }
 0xa40   :  { %v664_v41 = vadd.f32 0.5, %v663_v40 }
 0xa42   :  { %v669_v45 = vmul.f32 %v667_v44, %v664_v41 }
 0xaae   :  { %v672_v42 = vpop.permute.xlu0 %671 }
 0xaaf   :  { %v674_v43 = vmul.f32 %v672_v42, %v664_v41 }
 0xab1   :  { %676 = vrot.lane.b32.xlu1 %v674_v43, %s1659_s4 }
 0xb23   :  { %v677_v46 = vpop.permute.xlu1 %676 }
 0xb24   :  { %v679_v47 = vadd.f32 %v677_v46, %v669_v45 }
 0xb26   :  { %1529 = vtanh.f32 %v679_v47  ;;  %v769_v63 = vrot.slane %v679_v47, 6 }
 0xb30   :  { %v1530_v48 = vpop.eup %1529 }
 0xb31   :  { %682 = vrot.lane.b32.xlu0 %v1530_v48, %s1658_s24 }
 0xba3   :  { %v683_v33 = vpop.permute.xlu0 %682 }
 0xba4   :  { %v685_v49 = vmul.f32 %v683_v33, %v664_v41 }
 0xba6   :  { %v687_v50 = vrot.slane %v685_v49, 6  ;;  %v1848_v51 = vsel %vm1106_vm9, %v1105_v29, %v685_v49 }
 0xba8   :  { %688 = vrot.lane.b32.xlu1 %v687_v50, %s1659_s4 }
 0xc1a   :  { %v689_v52 = vpop.permute.xlu1 %688 }
 0xc1b   :  { %1375 = vmatmul.mubr.msk.f32.vlgmr.msra.gmra.mrb[4].mxu1 %vm275_vm6, %v689_v52 }
 0xc1c   :  { %1477 = vmatpush3.bf16.msra.mxu1 %v1767_v14  ;;  %1396 = vmatprep.mubr.msk.f32.mxu1 %vm1656_vm4, %v1657_v21 }
 0xc1d   :  { %1478 = vmatprep.subr.bf16.mxu1 %v1654_v11 }
 0xc20   :  { %1480 = vmatpush3.bf16.msra.mxu1 %v1771_v20 }
 0xcee   :  { %v758_v53 = vpop.f32.mrb[4].mxu1 }
 0xcef   :  { %v762_v54 = vadd.f32 %v758_v53, %v1797_v31  ;;  %v1376_v55 = vpop.f32.mrb[5].mxu1 }
 0xcf1   :  { %1531 = vtanh.f32 %v762_v54  ;;  %v763_v57 = vmul.f32 0.5, %v762_v54 }
 0xcf3   :  { %1533 = vtanh.f32 %v763_v57 }
 0xcfb   :  { %v1532_v56 = vpop.eup %1531 }
 0xcfc   :  { %773 = vrot.lane.b32.xlu0 %v1532_v56, %s1658_s24 }
 0xcfd   :  { %v1534_v58 = vpop.eup %1533 }
 0xcfe   :  { %v765_v59 = vmul.f32 0.5, %v1534_v58 }
 0xd00   :  { %v766_v60 = vadd.f32 0.5, %v765_v59 }
 0xd02   :  { %v771_v0 = vmul.f32 %v769_v63, %v766_v60 }
 0xd6e   :  { %v774_v61 = vpop.permute.xlu0 %773 }
 0xd6f   :  { %v776_v62 = vmul.f32 %v774_v61, %v766_v60 }
 0xd71   :  { %778 = vrot.lane.b32.xlu1 %v776_v62, %s1659_s4 }
 0xde3   :  { %v779_v1 = vpop.permute.xlu1 %778 }
 0xde4   :  { %v781_v2 = vadd.f32 %v779_v1, %v771_v0 }
 0xde6   :  { %1535 = vtanh.f32 %v781_v2 }
 0xdf0   :  { %v1536_v3 = vpop.eup %1535 }
 0xdf1   :  { %784 = vrot.lane.b32.xlu0 %v1536_v3, %s1658_s24 }
 0xe63   :  { %v785_v4 = vpop.permute.xlu0 %784 }
 0xe64   :  { %v787_v5 = vmul.f32 %v785_v4, %v766_v60 }
 0xe66   :  { %789 = vrot.lane.b32.xlu1 %v787_v5, %s1659_s4 }
 0xed8   :  { %v790_v6 = vpop.permute.xlu1 %789 }
 0xed9   :  { %1386 = vmatmul.mubr.msk.f32.vlgmr.msra.gmra.mrb[8].mxu0 %vm275_vm6, %v790_v6 }
 0xeda   :  { %1483 = vmatpush3.bf16.msra.mxu0 %v1767_v14  ;;  %1407 = vmatprep.mubr.msk.f32.mxu0 %vm1656_vm4, %v1657_v21 }
 0xedb   :  { %1484 = vmatprep.subr.bf16.mxu0 %v1654_v11  ;;  %v873_v11 = vrot.slane %v781_v2, 6 }
 0xede   :  { %1486 = vmatpush3.bf16.msra.mxu0 %v1771_v20 }
 0xfac   :  { %v859_v7 = vpop.f32.mrb[8].mxu0 }
 0xfad   :  { %v864_v8 = vrot.slane %v859_v7, 6  ;;  %v1387_v9 = vpop.f32.mrb[9].mxu0 }
 0xfaf   :  { %v866_v10 = vadd.f32 %v864_v8, %v1797_v31 }
 0xfb1   :  { %1537 = vtanh.f32 %v866_v10  ;;  %v867_v13 = vmul.f32 0.5, %v866_v10 }
 0xfb3   :  { %1539 = vtanh.f32 %v867_v13 }
 0xfbb   :  { %v1538_v12 = vpop.eup %1537 }
 0xfbc   :  { %877 = vrot.lane.b32.xlu0 %v1538_v12, %s1658_s24 }
 0xfbd   :  { %v1540_v15 = vpop.eup %1539 }
 0xfbe   :  { %v869_v14 = vmul.f32 0.5, %v1540_v15 }
 0xfc0   :  { %v870_v16 = vadd.f32 0.5, %v869_v14 }
 0xfc2   :  { %v875_v20 = vmul.f32 %v873_v11, %v870_v16 }
0x102e   :  { %v878_v17 = vpop.permute.xlu0 %877 }
0x102f   :  { %v880_v21 = vmul.f32 %v878_v17, %v870_v16 }
0x1031   :  { %882 = vrot.lane.b32.xlu1 %v880_v21, %s1659_s4 }
0x10a3   :  { %v883_v18 = vpop.permute.xlu1 %882 }
0x10a4   :  { %v885_v19 = vadd.f32 %v883_v18, %v875_v20 }
0x10a6   :  { %1541 = vtanh.f32 %v885_v19  ;;  %v978_v40 = vrot.slane %v885_v19, 6 }
0x10b0   :  { %v1542_v22 = vpop.eup %1541 }
0x10b1   :  { %888 = vrot.lane.b32.xlu0 %v1542_v22, %s1658_s24 }
0x1123   :  { %v889_v23 = vpop.permute.xlu0 %888 }
0x1124   :  { %v891_v24 = vmul.f32 %v889_v23, %v870_v16 }
0x1126   :  { %v893_v25 = vrot.slane %v891_v24, 2  ;;  %v1108_v47 = vsel %vm1102_vm7, %v787_v5, %v891_v24 }
0x1128   :  { %894 = vrot.lane.b32.xlu1 %v893_v25, %s1659_s4 }
0x119a   :  { %v895_v26 = vpop.permute.xlu1 %894 }
0x119b   :  { %1397 = vmatmul.mubr.msk.f32.vlgmr.msra.gmra.mrb[6].mxu1 %vm275_vm6, %v895_v26 }
0x126e   :  { %v964_v27 = vpop.f32.mrb[6].mxu1 }
0x126f   :  { %v969_v28 = vrot.slane %v964_v27, 4  ;;  %v1398_v29 = vpop.f32.mrb[7].mxu1 }
0x1271   :  { %v971_v30 = vadd.f32 %v969_v28, %v1797_v31 }
0x1273   :  { %1543 = vtanh.f32 %v971_v30  ;;  %v972_v34 = vmul.f32 0.5, %v971_v30 }
0x1275   :  { %1545 = vtanh.f32 %v972_v34 }
0x127d   :  { %v1544_v32 = vpop.eup %1543 }
0x127e   :  { %982 = vrot.lane.b32.xlu0 %v1544_v32, %s1658_s24 }
0x127f   :  { %v1546_v35 = vpop.eup %1545 }
0x1280   :  { %v974_v36 = vmul.f32 0.5, %v1546_v35 }
0x1282   :  { %v975_v37 = vadd.f32 0.5, %v974_v36 }
0x1284   :  { %v980_v41 = vmul.f32 %v978_v40, %v975_v37 }
0x12f0   :  { %v983_v38 = vpop.permute.xlu0 %982 }
0x12f1   :  { %v985_v39 = vmul.f32 %v983_v38, %v975_v37 }
0x12f3   :  { %987 = vrot.lane.b32.xlu1 %v985_v39, %s1659_s4 }
0x1365   :  { %v988_v42 = vpop.permute.xlu1 %987 }
0x1366   :  { %v990_v43 = vadd.f32 %v988_v42, %v980_v41 }
0x1368   :  { %1547 = vtanh.f32 %v990_v43  ;;  %v1083_v62 = vrot.slane %v990_v43, 6 }
0x1372   :  { %v1548_v44 = vpop.eup %1547 }
0x1373   :  { %993 = vrot.lane.b32.xlu0 %v1548_v44, %s1658_s24 }
0x13e5   :  { %v994_v45 = vpop.permute.xlu0 %993 }
0x13e6   :  { %v996_v46 = vmul.f32 %v994_v45, %v975_v37 }
0x13e8   :  { %v998_v48 = vrot.slane %v996_v46, 4  ;;  %v1109_v33 = vsel %vm1104_vm8, %v1108_v47, %v996_v46 }
0x13ea   :  { %999 = vrot.lane.b32.xlu1 %v998_v48, %s1659_s4 }
0x145c   :  { %v1000_v49 = vpop.permute.xlu1 %999 }
0x145d   :  { %1408 = vmatmul.mubr.msk.f32.vlgmr.msra.gmra.mrb[10].mxu0 %vm275_vm6, %v1000_v49 }
0x1530   :  { %v1069_v50 = vpop.f32.mrb[10].mxu0 }
0x1531   :  { %v1074_v52 = vrot.slane %v1069_v50, 2  ;;  %v1409_v53 = vpop.f32.mrb[11].mxu0 }
0x1533   :  { %v1076_v54 = vadd.f32 %v1074_v52, %v1797_v31 }
0x1535   :  { %1549 = vtanh.f32 %v1076_v54  ;;  %v1077_v56 = vmul.f32 0.5, %v1076_v54 }
0x1537   :  { %1551 = vtanh.f32 %v1077_v56 }
0x153f   :  { %v1550_v55 = vpop.eup %1549 }
0x1540   :  { %1087 = vrot.lane.b32.xlu0 %v1550_v55, %s1658_s24 }
0x1541   :  { %v1552_v57 = vpop.eup %1551 }
0x1542   :  { %v1079_v58 = vmul.f32 0.5, %v1552_v57 }
0x1544   :  { %v1080_v59 = vadd.f32 0.5, %v1079_v58 }
0x1546   :  { %v1085_v63 = vmul.f32 %v1083_v62, %v1080_v59 }
0x15b2   :  { %v1088_v60 = vpop.permute.xlu0 %1087 }
0x15b3   :  { %v1090_v61 = vmul.f32 %v1088_v60, %v1080_v59 }
0x15b5   :  { %1092 = vrot.lane.b32.xlu1 %v1090_v61, %s1659_s4 }
0x1627   :  { %v1093_v0 = vpop.permute.xlu1 %1092 }
0x1628   :  { %v1095_v1 = vadd.f32 %v1093_v0, %v1085_v63 }
0x162a   :  { %1553 = vtanh.f32 %v1095_v1 }
0x162b   :  { %1630 = shalt.err (!%p1627_p12)  }
0x162c   :  { %s1631_s12 = scalar_lea.vmem %s76_s26, 512  ;;  %p1636_p0 = scmp.lt.s32.totalorder %s76_s26, %s76_s26 }
0x162d   :  { %p1632_p13 = scmp.ne.s32.totalorder %s76_s26, %s1631_s12  ;;  %p1637_p1 = scmp.lt.s32.totalorder %s1631_s12, %s1631_s12 }
0x162f   :  { %p1638_p2 = por %p1637_p1, %p1636_p0 }
0x1631   :  { %p1639_p3 = pnand %p1638_p2, %p1632_p13 }
0x1633   :  { %1642 = shalt.err (!%p1639_p3)  }
0x1634   :  { %78 = dma.hbm_to_vmem [thread:$0]  %s1920_s7, 512, %s76_s26, [#allocation3]  ;;  %v1554_v31 = vpop.eup %1553 }
0x1635   :  { %1098 = vrot.lane.b32.xlu0 %v1554_v31, %s1658_s24 }
0x1639   :  { %1127 = vrot.lane.b32.xlu0 %v1848_v51, %s1659_s4 }
0x16a7   :  { %v1099_v2 = vpop.permute.xlu0 %1098 }
0x16a8   :  { %v1101_v3 = vmul.f32 %v1099_v2, %v1080_v59 }
0x16aa   :  { %v1110_v4 = vsel %vm1106_vm9, %v1109_v33, %v1101_v3 }
0x16ab   :  { %1647 = dma.done.wait [#allocation3], 512 }
0x16ac   :  { %1648 = vsyncadd [#allocation3], 4294966784  ;;  %1129 = vrot.lane.b32.xlu0 %v1110_v4, %s1659_s4  ;;  %v1114_v5 = vld [vmem:[#allocation2] sm:$0xff]  ;;  %v1115_v6 = vld [vmem:[#allocation2 + $0x8] sm:$0xff]  ;;  %v1128_v12 = vpop.permute.xlu0 %1127 }
0x16ad   :  { %v1116_v7 = vld [vmem:[#allocation2 + $0x10] sm:$0xff]  ;;  %v1487_v8 = vpack.c.bf16 %v1115_v6, %v1114_v5  ;;  %v1117_v9 = vld [vmem:[#allocation2 + $0x18] sm:$0xff]  ;;  %1418 = vmatprep.mubr.msk.f32.mxu1 %vm275_vm6, %v1128_v12  ;;  %v1238_v51 = vld [vmem:[%s1919_s6] ss:$0 sm:$0xff] }
0x16ae   :  { %v1491_v10 = vpack.c.bf16 %v1117_v9, %v1116_v7 }
0x16af   :  { %1488 = vmatprep.subr.bf16.mxu1 %v1487_v8 }
0x16b0   :  { %1490 = vmatpush3.bf16.msra.mxu1 %v1487_v8 }
0x16b1   :  { %1492 = vmatprep.subr.bf16.mxu1 %v1491_v10 }
0x16b4   :  { %1494 = vmatpush3.bf16.msra.mxu1 %v1491_v10 }
0x171e   :  { %v1130_v13 = vpop.permute.xlu0 %1129 }
0x171f   :  { %1419 = vmatmul.mubr.msk.f32.vlgmr.msra.gmra.mrb[8].mxu1 %vm275_vm6, %v1130_v13 }
0x17f2   :  { %v1420_v15 = vpop.f32.mrb[8].mxu1 }
0x17f3   :  { %v1207_v14 = vadd.f32 %v1420_v15, %v1238_v51  ;;  %v1201_v16 = vpop.f32.mrb[9].mxu1 }
0x17f4   :  { %v1202_v17 = vadd.f32 %v1238_v51, %v1201_v16 }
0x17f5   :  { %1211 = vst [vmem:[%s1921_s8 + $0x8] sm:$0xff] %v1207_v14 }
0x17f6   :  { %1210 = vst [vmem:[%s1921_s8] sm:$0xff] %v1202_v17 }
0x17f7   :  { %1216 = vsyncpa [#allocation5], 1 }
0x17f8   :  { %1217 = vsyncpa [#allocation7], 1 }
0x17f9   :  { %1218 = vsyncmov [#allocation3] }
0x17fc   :  { %s1219_s30 = vpop.sfrf %1218 }
0x17fd   :  { %p1241_p4 = scmp.ne.s32.totalorder %s1219_s30, 0 }
0x17ff   :  { %1223 = shalt.err (%p1241_p4)  }

</bundles_post_ra>
